<compile_context>
chip_gen: v7x
topology: tpu7x:2x2x1
jax: 0.10.0
libtpu: 0.0.40
codegen_flags: <defaults>
</compile_context>

<pallas_src>
import functools

import jax
import jax.numpy as jnp
from jax.experimental import pallas as pl
from jax.experimental.pallas import tpu as pltpu


def _round_up(x, m):
    return ((x + m - 1) // m) * m


# ----------------------------- Pallas kernel ------------------------------ #
def edge_embedding_kernel(ids_ref, num_ref, w_emb_ref, w_num_ref, out_ref, *,
                          vocab, sub_rows):
    """One grid step = tile_n edge rows, processed in `sub_rows` sub-blocks.

    ids_ref  : (TN, C)       int32    categorical ids (feature-index order)
    num_ref  : (TN, Dn_pad)  f32      numerical features (zero-padded cols)
    w_emb_ref: (K_pad, H)    f32/bf16 stacked [tables[c] @ W2ᵀ], zero-padded
    w_num_ref: (Dn_pad, H)   f32/bf16 W1ᵀ @ W2ᵀ (zero-padded rows)
    out_ref  : (TN, H)       f32
    """
    tn, n_cat = ids_ref.shape
    k_pad = w_emb_ref.shape[0]
    w_dtype = w_emb_ref.dtype
    one = jnp.ones((), w_dtype)

    # Minimal-footprint lane iota; the == compare broadcasts it per sub-block.
    lane = jax.lax.broadcasted_iota(jnp.int32, (1, k_pad), 1)

    # Resident fused weights, read once per grid step.
    w_emb = w_emb_ref[...]
    w_num = w_num_ref[...]

    n_sub = tn // sub_rows
    for s in range(n_sub):                                   # small static loop
        r0 = s * sub_rows
        ids = ids_ref[pl.ds(r0, sub_rows), :]                # (rows, C)
        num = num_ref[pl.ds(r0, sub_rows), :]                # (rows, Dn_pad)

        # One-hot operand built directly in the weight dtype.  Validity
        # (padding id==0 and out-of-range guard) is folded into the (rows,1)
        # column index before the wide lane compare, so each categorical
        # feature costs one wide cmp + one wide select.
        x = jnp.zeros((sub_rows, k_pad), w_dtype)
        for c in range(n_cat):
            col = ids[:, c:c + 1]                            # (rows, 1)
            valid = (col != 0) & (col < vocab)               # (rows, 1)
            col_eff = jnp.where(valid, col + c * vocab, -1)  # -1 never matches
            x = jnp.where(lane == col_eff, one, x)           # disjoint lanes

        # Two MXU matmuls (categorical one-hot + numerical), f32 accumulation.
        acc = jnp.dot(x, w_emb, preferred_element_type=jnp.float32)
        acc = acc + jnp.dot(num.astype(w_dtype), w_num,
                            preferred_element_type=jnp.float32)
        out_ref[pl.ds(r0, sub_rows), :] = acc.astype(out_ref.dtype)


# --------------------------- weight preparation ---------------------------- #
def prepare_fused_weights(tables, w1_t, w2_t, *, feat_sizes=None,
                          compute_dtype=jnp.float32):
    """Fold linear2 into the embedding tables and linear1.

    tables : (C, V, E)  per-feature tables on a shared padded vocab V
    w1_t   : (Dn, E)    linear1 weight stored transposed (in_features, out)
    w2_t   : (E, H)     linear2 weight stored transposed
    feat_sizes: per-categorical-slot max_size; rows > max_size (and the
        padding row 0) are zeroed here so the kernel's shared-V OOB guard
        can never pick up stale table data.
    Returns (w_emb (K_pad, H), w_num (Dn_pad, H)) in `compute_dtype`
    (use jnp.float32 on v5e — no bf16 VPU; bf16 on v6e/v7x).
    """
    c, v, _ = tables.shape
    dn, h = w1_t.shape[0], w2_t.shape[1]

    # Enforce the nn.Embedding contract inside the fold.
    tables = tables.at[:, 0, :].set(0.0)
    if feat_sizes is not None:
        for slot, size in enumerate(feat_sizes):
            tables = tables.at[slot, size + 1:, :].set(0.0)

    k_real = c * v
    k_pad = _round_up(k_real, 128)
    # TODO(synk): for large vocabularies (K_pad beyond a few hundred lanes)
    # the one-hot-matmul trick stops paying off; switch to a gather-based
    # kernel (scalar-prefetched ids + VMEM-resident table take) instead.
    tables2 = jnp.einsum("cve,eh->cvh", tables, w2_t).reshape(k_real, h)
    w_emb = jnp.zeros((k_pad, h), jnp.float32).at[:k_real].set(tables2)

    dn_pad = _round_up(dn, 8)
    w12 = jnp.dot(w1_t, w2_t)                                # (Dn, H)
    w_num = jnp.zeros((dn_pad, h), jnp.float32).at[:dn].set(w12)
    return w_emb.astype(compute_dtype), w_num.astype(compute_dtype)


# ------------------------------- wrapper ----------------------------------- #
@functools.partial(jax.jit, static_argnames=("vocab", "tile_n", "sub_rows"))
def edge_embedding_forward(cat_ids, num_feats, w_emb, w_num, *, vocab,
                           tile_n=512, sub_rows=128):
    n, n_cat = cat_ids.shape
    dn = num_feats.shape[1]
    k_pad, h = w_emb.shape
    dn_pad = w_num.shape[0]

    # Cap the tile so the grid keeps >= 2 steps (v7x: 2 TensorCores get work
    # via dimension_semantics=("parallel",)); keep it a multiple of sub_rows.
    eff_tile = min(tile_n, _round_up(max(pl.cdiv(n, 2), 1), sub_rows))
    eff_tile = max(sub_rows, (eff_tile // sub_rows) * sub_rows)

    n_pad = pl.cdiv(n, eff_tile) * eff_tile
    if n_pad != n or dn_pad != dn:
        # Padded rows have id==0 / num==0 -> exactly zero output; sliced off.
        cat_ids = jnp.pad(cat_ids, ((0, n_pad - n), (0, 0)))
        num_feats = jnp.pad(num_feats, ((0, n_pad - n), (0, dn_pad - dn)))
    grid = (n_pad // eff_tile,)

    kernel = functools.partial(edge_embedding_kernel, vocab=vocab,
                               sub_rows=sub_rows)

    flops = 2 * n_pad * (k_pad + dn_pad) * h
    bytes_accessed = int(
        cat_ids.size * 4 + num_feats.size * 4
        + w_emb.size * w_emb.dtype.itemsize
        + w_num.size * w_num.dtype.itemsize
        + n_pad * h * 4)

    # Explicit VMEM budget only when scaling beyond the 32 MiB default scoped
    # limit (v7x has 64 MiB physical VMEM per TensorCore).
    w_bytes = (w_emb.size * w_emb.dtype.itemsize
               + w_num.size * w_num.dtype.itemsize)
    vmem_est = (2 * eff_tile * (n_cat * 4 + dn_pad * 4 + h * 4)
                + 2 * w_bytes + (2 << 20))
    cp_kwargs = dict(dimension_semantics=("parallel",))
    if vmem_est > (32 << 20):
        cp_kwargs["vmem_limit_bytes"] = int(min(vmem_est, 64 << 20))

    out = pl.pallas_call(
        kernel,
        out_shape=jax.ShapeDtypeStruct((n_pad, h), jnp.float32),
        grid_spec=pltpu.PrefetchScalarGridSpec(
            num_scalar_prefetch=0,
            grid=grid,
            in_specs=[
                pl.BlockSpec((eff_tile, n_cat), lambda i: (i, 0)),
                pl.BlockSpec((eff_tile, dn_pad), lambda i: (i, 0)),
                pl.BlockSpec((k_pad, h), lambda i: (0, 0)),   # resident weight
                pl.BlockSpec((dn_pad, h), lambda i: (0, 0)),  # resident weight
            ],
            out_specs=pl.BlockSpec((eff_tile, h), lambda i: (i, 0)),
        ),
        compiler_params=pltpu.CompilerParams(**cp_kwargs),
        cost_estimate=pl.CostEstimate(
            flops=flops, transcendentals=0, bytes_accessed=bytes_accessed),
    )(cat_ids, num_feats, w_emb, w_num)
    return out[:n] if n_pad != n else out


# ---------------------------- pure-JAX reference ---------------------------- #
def reference(edge_feats, feat_dtypes, tables, w1_t, w2_t):
    obj = None
    nums = []
    cat_slot = 0
    for idx, dt in enumerate(feat_dtypes):
        if dt == "categorical":
            ids = edge_feats[:, idx].astype(jnp.int32)
            emb = tables[cat_slot][ids]
            emb = jnp.where((ids == 0)[:, None], 0.0, emb)
            obj = emb if obj is None else obj + emb
            cat_slot += 1
        else:
            nums.append(edge_feats[:, idx])
    num = jnp.stack(nums, axis=-1)
    return (obj + num @ w1_t) @ w2_t


# ---------------------------------- main ------------------------------------ #
if __name__ == "__main__":
    # synthetic "mdatas": feature idx -> dtype (categorical also has max_size)
    feat_dtypes = ["categorical", "numerical", "categorical", "numerical", "numerical"]
    max_sizes = {0: 15, 2: 11}      # nn.Embedding(max_size + 1, E, padding_idx=0)
    embed_dim = 32
    hidden_dim = 64
    N = 256                          # number of edges (>= 2 grid steps of 128)
    F = len(feat_dtypes)
    cat_idx = [i for i, d in enumerate(feat_dtypes) if d == "categorical"]
    num_idx = [i for i, d in enumerate(feat_dtypes) if d == "numerical"]
    C, Dn = len(cat_idx), len(num_idx)
    V = max(max_sizes[i] + 1 for i in cat_idx)   # shared padded vocab size

    key = jax.random.PRNGKey(0)
    k_tab, k_w1, k_w2, k_cat, k_num = jax.random.split(key, 5)

    # Embedding tables (C, V, E).  NOTE: padding row / rows beyond each
    # feature's own vocab are zeroed inside prepare_fused_weights.
    tables = jax.random.normal(k_tab, (C, V, embed_dim), jnp.float32) * 0.1
    # Reference reads table rows only for valid ids; zero row 0 for clarity.
    tables_ref = tables.at[:, 0, :].set(0.0)

    # Linear weights, stored transposed: (in_features, out_features).
    w1_t = jax.random.normal(k_w1, (Dn, embed_dim), jnp.float32) * 0.1
    w2_t = jax.random.normal(k_w2, (embed_dim, hidden_dim), jnp.float32) * 0.1

    # edge_feats: (N, F) float32 — categorical columns hold integer ids
    # (including some 0s to exercise the padding mask), numerical cols floats.
    edge_feats = jnp.zeros((N, F), jnp.float32)
    cat_vals = jax.random.randint(
        k_cat, (N, C), 0, jnp.array([max_sizes[i] + 1 for i in cat_idx])
    )
    num_vals = jax.random.normal(k_num, (N, Dn), jnp.float32)
    for s, idx in enumerate(cat_idx):
        edge_feats = edge_feats.at[:, idx].set(cat_vals[:, s].astype(jnp.float32))
    for s, idx in enumerate(num_idx):
        edge_feats = edge_feats.at[:, idx].set(num_vals[:, s])

    # Glue: split columns by dtype (same order as the PyTorch forward loop).
    cat_ids = edge_feats[:, jnp.array(cat_idx)].astype(jnp.int32)      # (N, C)
    num_feats = edge_feats[:, jnp.array(num_idx)].astype(jnp.float32)  # (N, Dn)
    feat_sizes = [max_sizes[i] for i in cat_idx]

    ref = jax.block_until_ready(
        reference(edge_feats, feat_dtypes, tables_ref, w1_t, w2_t))

    # --- f32 fused-weight path (tight check; fusion only reorders f32 sums) ---
    we32, wn32 = prepare_fused_weights(tables, w1_t, w2_t,
                                       feat_sizes=feat_sizes,
                                       compute_dtype=jnp.float32)
    out_f32 = edge_embedding_forward(cat_ids, num_feats, we32, wn32, vocab=V)
    out_f32 = jax.block_until_ready(out_f32)
    assert out_f32.shape == (N, hidden_dim)
    assert jnp.allclose(out_f32, ref, atol=1e-4, rtol=1e-4), "f32 mismatch vs reference"

    # --- bf16 fused-weight path (v6e/v7x MXU fast path; f32 accumulation) ---
    we16, wn16 = prepare_fused_weights(tables, w1_t, w2_t,
                                       feat_sizes=feat_sizes,
                                       compute_dtype=jnp.bfloat16)
    out_bf16 = edge_embedding_forward(cat_ids, num_feats, we16, wn16, vocab=V)
    out_bf16 = jax.block_until_ready(out_bf16)
    assert out_bf16.shape == (N, hidden_dim)
    assert jnp.allclose(out_bf16, ref, atol=1e-2, rtol=2e-2), "bf16 mismatch vs reference"

    print("KERNEL_OK")
</pallas_src>

<mosaic_0001>
module attributes {stable_mosaic.version = 11 : i64} {
  func.func @edge_embedding_kernel(%arg0: i32, %arg1: memref<128x2xi32, #tpu.memory_space<vmem>>, %arg2: memref<128x8xf32, #tpu.memory_space<vmem>>, %arg3: memref<128x64xf32, #tpu.memory_space<vmem>>, %arg4: memref<8x64xf32, #tpu.memory_space<vmem>>, %arg5: memref<128x64xf32, #tpu.memory_space<vmem>>) attributes {dimension_semantics = [#tpu.dimension_semantics<parallel>], iteration_bounds = array<i64: 2>, scalar_prefetch = 0 : i64, scratch_operands = 0 : i64, tpu.core_type = #tpu.core_type<tc>, window_params = [{transform_indices = @transform_0, window_bounds = array<i64: 128, 2>}, {transform_indices = @transform_1, window_bounds = array<i64: 128, 8>}, {pipeline_mode = #tpu.pipeline_mode<synchronous>, transform_indices = @transform_2, window_bounds = array<i64: 128, 64>}, {pipeline_mode = #tpu.pipeline_mode<synchronous>, transform_indices = @transform_3, window_bounds = array<i64: 8, 64>}, {transform_indices = @transform_4, window_bounds = array<i64: 128, 64>}]} {
    %0 = tpu.iota {dimensions = array<i32: 1>} : vector<1x128xi32>
    %c0 = arith.constant 0 : index
    %c0_0 = arith.constant 0 : index
    %1 = vector.load %arg3[%c0, %c0_0] : memref<128x64xf32, #tpu.memory_space<vmem>>, vector<128x64xf32>
    %c0_1 = arith.constant 0 : index
    %c0_2 = arith.constant 0 : index
    %2 = vector.load %arg4[%c0_1, %c0_2] : memref<8x64xf32, #tpu.memory_space<vmem>>, vector<8x64xf32>
    %c0_3 = arith.constant 0 : index
    %c0_4 = arith.constant 0 : index
    %3 = vector.load %arg1[%c0_3, %c0_4] : memref<128x2xi32, #tpu.memory_space<vmem>>, vector<128x2xi32>
    %c0_5 = arith.constant 0 : index
    %c0_6 = arith.constant 0 : index
    %4 = vector.load %arg2[%c0_5, %c0_6] : memref<128x8xf32, #tpu.memory_space<vmem>>, vector<128x8xf32>
    %cst = arith.constant 0.000000e+00 : f32
    %5 = vector.broadcast %cst : f32 to vector<128x128xf32>
    %6 = vector.extract_strided_slice %3 {offsets = [0, 0], sizes = [128, 1], strides = [1, 1]} : vector<128x2xi32> to vector<128x1xi32>
    %c0_i32 = arith.constant 0 : i32
    %7 = vector.broadcast %c0_i32 : i32 to vector<128x1xi32>
    %8 = arith.cmpi ne, %6, %7 : vector<128x1xi32>
    %c16_i32 = arith.constant 16 : i32
    %9 = vector.broadcast %c16_i32 : i32 to vector<128x1xi32>
    %10 = arith.cmpi slt, %6, %9 : vector<128x1xi32>
    %11 = arith.andi %8, %10 : vector<128x1xi1>
    %c0_i32_7 = arith.constant 0 : i32
    %12 = vector.broadcast %c0_i32_7 : i32 to vector<128x1xi32>
    %13 = arith.addi %6, %12 : vector<128x1xi32>
    %c-1_i32 = arith.constant -1 : i32
    %14 = vector.broadcast %c-1_i32 : i32 to vector<128x1xi32>
    %15 = arith.select %11, %13, %14 : vector<128x1xi1>, vector<128x1xi32>
    %16 = vector.broadcast %0 : vector<1x128xi32> to vector<128x128xi32>
    %17 = vector.broadcast %15 : vector<128x1xi32> to vector<128x128xi32>
    %18 = arith.cmpi eq, %16, %17 : vector<128x128xi32>
    %cst_8 = arith.constant 1.000000e+00 : f32
    %19 = vector.broadcast %cst_8 : f32 to vector<128x128xf32>
    %20 = arith.select %18, %19, %5 : vector<128x128xi1>, vector<128x128xf32>
    %21 = vector.extract_strided_slice %3 {offsets = [0, 1], sizes = [128, 1], strides = [1, 1]} : vector<128x2xi32> to vector<128x1xi32>
    %c0_i32_9 = arith.constant 0 : i32
    %22 = vector.broadcast %c0_i32_9 : i32 to vector<128x1xi32>
    %23 = arith.cmpi ne, %21, %22 : vector<128x1xi32>
    %c16_i32_10 = arith.constant 16 : i32
    %24 = vector.broadcast %c16_i32_10 : i32 to vector<128x1xi32>
    %25 = arith.cmpi slt, %21, %24 : vector<128x1xi32>
    %26 = arith.andi %23, %25 : vector<128x1xi1>
    %c16_i32_11 = arith.constant 16 : i32
    %27 = vector.broadcast %c16_i32_11 : i32 to vector<128x1xi32>
    %28 = arith.addi %21, %27 : vector<128x1xi32>
    %c-1_i32_12 = arith.constant -1 : i32
    %29 = vector.broadcast %c-1_i32_12 : i32 to vector<128x1xi32>
    %30 = arith.select %26, %28, %29 : vector<128x1xi1>, vector<128x1xi32>
    %31 = vector.broadcast %0 : vector<1x128xi32> to vector<128x128xi32>
    %32 = vector.broadcast %30 : vector<128x1xi32> to vector<128x128xi32>
    %33 = arith.cmpi eq, %31, %32 : vector<128x128xi32>
    %cst_13 = arith.constant 1.000000e+00 : f32
    %34 = vector.broadcast %cst_13 : f32 to vector<128x128xf32>
    %35 = arith.select %33, %34, %20 : vector<128x128xi1>, vector<128x128xf32>
    %cst_14 = arith.constant dense<0.000000e+00> : vector<128x64xf32>
    %36 = tpu.matmul %35, %1, %cst_14 {dimension_numbers = #tpu.dot_dimension_numbers<[1], [0], [0], [1], [0, 0, 1, 1], [], []>} : vector<128x128xf32>, vector<128x64xf32>, vector<128x64xf32> -> vector<128x64xf32>
    %cst_15 = arith.constant dense<0.000000e+00> : vector<128x64xf32>
    %37 = tpu.matmul %4, %2, %cst_15 {dimension_numbers = #tpu.dot_dimension_numbers<[1], [0], [0], [1], [0, 0, 1, 1], [], []>} : vector<128x8xf32>, vector<8x64xf32>, vector<128x64xf32> -> vector<128x64xf32>
    %38 = arith.addf %36, %37 : vector<128x64xf32>
    %c0_16 = arith.constant 0 : index
    %c0_17 = arith.constant 0 : index
    %39 = vector.load %arg5[%c0_16, %c0_17] : memref<128x64xf32, #tpu.memory_space<vmem>>, vector<128x64xf32>
    tpu.vector_store %arg5[%c0_16, %c0_17], %38 {strides = array<i32>} : memref<128x64xf32, #tpu.memory_space<vmem>>, vector<128x64xf32>,
    return
  }
  func.func @transform_0(%arg0: i32) -> (i32, i32) {
    %c0_i32 = arith.constant 0 : i32
    %c0_i32_0 = arith.constant 0 : i32
    return %arg0, %c0_i32 : i32, i32
  }
  func.func @transform_1(%arg0: i32) -> (i32, i32) {
    %c0_i32 = arith.constant 0 : i32
    %c0_i32_0 = arith.constant 0 : i32
    return %arg0, %c0_i32 : i32, i32
  }
  func.func @transform_2(%arg0: i32) -> (i32, i32) {
    %c0_i32 = arith.constant 0 : i32
    %c0_i32_0 = arith.constant 0 : i32
    %c0_i32_1 = arith.constant 0 : i32
    return %c0_i32, %c0_i32_0 : i32, i32
  }
  func.func @transform_3(%arg0: i32) -> (i32, i32) {
    %c0_i32 = arith.constant 0 : i32
    %c0_i32_0 = arith.constant 0 : i32
    %c0_i32_1 = arith.constant 0 : i32
    return %c0_i32, %c0_i32_0 : i32, i32
  }
  func.func @transform_4(%arg0: i32) -> (i32, i32) {
    %c0_i32 = arith.constant 0 : i32
    %c0_i32_0 = arith.constant 0 : i32
    return %arg0, %c0_i32 : i32, i32
  }
}

</mosaic_0001>

<bundles_post_ra>
// kernel: edge_embedding_forward.1
= control target key start
LH: loop header
LB: loop body
LE: loop exit
PB: predicated region body
PF: predicated region fallthrough
CT: control target
= control target key end

     0   :  { %s1238_s15 = smov 0   ;;  %s1618_s0 = inlined_call_operand.vmem [shape: s32[256,2], index: 0, kind: input, shape index: {}]   ;;  %s1619_s1 = inlined_call_operand.vmem [shape: f32[256,8], index: 1, kind: input, shape index: {}]   ;;  %s1620_s2 = inlined_call_operand.vmem [shape: f32[128,64], index: 2, kind: input, shape index: {}]   ;;  %s1621_s3 = inlined_call_operand.vmem [shape: f32[8,64], index: 3, kind: input, shape index: {}]   ;;  %s1622_s4 = inlined_call_operand.vmem [shape: f32[256,64], index: 4, kind: output, shape index: {}]  }
   0x1 LB: > { %s954_s16 = sadd.s32 4294967295, %s1208_s15   ;;  %p958_p0 = scmp.ge.s32.totalorder %s1208_s15, 1  ;;  %s1208_s15 = sphi %s1238_s15, %s14_s15  }
   0x2   : > { %p174_p1 = scmp.lt.s32.totalorder %s1208_s15, 3 }
   0x4   : > { %p175_p2 = pnand %p958_p0, %p174_p1 }
   0x5   : > { %s959_s17 = sshll.u32 (!%p175_p2), %s954_s16, 4  ;;  %v241_v0 = vld [vmem:[%s1621_s3] sm:$0xff] (!%p175_p2)  ;;  %v1210_v2 = vmov (!%p175_p2), 1   ;;  %v1211_v3 = vmov (!%p175_p2), 0   ;;  %v226_v4 = vld [vmem:[%s1620_s2 + $0x8] sm:$0xff] (!%p175_p2)  ;;  %v227_v5 = vld [vmem:[%s1620_s2 + $0x10] sm:$0xff] (!%p175_p2) }
   0x6   : > { %178 = sbr.rel (%p175_p2) target bundleno = 451 (0x1c3), region = 36  ;;  %v225_v1 = vld [vmem:[%s1620_s2] sm:$0xff] (!%p175_p2)  ;;  %1190 = vset.pattern.permute.xlu1 (!%p175_p2), %v1210_v2  ;;  %1189 = vset.pattern.permute.xlu0 (!%p175_p2), %v1211_v3  ;;  %p206_p3 = scmp.lt.s32.totalorder (!%p175_p2), %s959_s17, 31  ;;  %v228_v6 = vld [vmem:[%s1620_s2 + $0x18] sm:$0xff] (!%p175_p2)  ;;  %v230_v10 = vld [vmem:[%s1620_s2 + $0x28] sm:$0xff] (!%p175_p2)  ;;  %vm530_vm14 = vcmask (!%p175_p2), 64512  }
   0x7   : > { %1032 = vmatprep.subr.mxu0 (!%p175_p2), %v241_v0  ;;  %v1114_v7 = vpack.c.bf16 (!%p175_p2), %v226_v4, %v225_v1  ;;  %v1263_v8 = vpack.c.bf16 (!%p175_p2), %v228_v6, %v227_v5  ;;  %v229_v9 = vld [vmem:[%s1620_s2 + $0x20] sm:$0xff] (!%p175_p2)  ;;  %v231_v46 = vld [vmem:[%s1620_s2 + $0x30] sm:$0xff] (!%p175_p2)  ;;  %v232_v47 = vld [vmem:[%s1620_s2 + $0x38] sm:$0xff] (!%p175_p2) }
   0x8   : > { %1033 = vmatpush3.msra.mxu0 (!%p175_p2), %v241_v0  ;;  %v1285_v14 = vpack.c.bf16 (!%p175_p2), %v230_v10, %v229_v9  ;;  %v233_v49 = vld [vmem:[%s1620_s2 + $0x40] sm:$0xff] (!%p175_p2)  ;;  %v234_v50 = vld [vmem:[%s1620_s2 + $0x48] sm:$0xff] (!%p175_p2)  ;;  %v1126_v54 = vpack.c.bf16 (!%p175_p2), %v232_v47, %v231_v46  ;;  %v235_v60 = vld [vmem:[%s1620_s2 + $0x50] sm:$0xff] (!%p175_p2) }
   0x9   : > { %1115 = vmatprep.subr.bf16.mxu0 (!%p175_p2), %v1114_v7  ;;  %1146 = vmatprep.subr.bf16.mxu1 (!%p175_p2), %v1114_v7  ;;  %v1130_v58 = vpack.c.bf16 (!%p175_p2), %v234_v50, %v233_v49  ;;  %v236_v61 = vld [vmem:[%s1620_s2 + $0x58] sm:$0xff] (!%p175_p2) }
   0xa   : > { %1154 = vmatpush3.bf16.msra.mxu1 (!%p175_p2), %v1114_v7  ;;  %v1134_v4 = vpack.c.bf16 (!%p175_p2), %v236_v61, %v235_v60 }
   0xb   : > { %1147 = vmatprep.subr.bf16.mxu1 (!%p175_p2), %v1263_v8 }
   0xd   : > { %s1650_s17 = smov (!%p206_p3, %s959_s17), 31 }
   0xe   : > { %s1271_s6 = sshll.u32 %s1650_s17, 3  ;;  %1155 = vmatpush3.bf16.msra.mxu1 %v1263_v8 }
   0xf   : > { %s1277_s9 = scalar_lea.vmem %s1618_s0, %s1271_s6  ;;  %1148 = vmatprep.subr.bf16.mxu1 %v1285_v14  ;;  %s1312_s12 = scalar_lea.vmem %s1619_s1, %s1271_s6 }
  0x10   : > { %v250_v11 = vld [vmem:[%s1277_s9 + $0x40] sm:$0xff]  ;;  %v1283_v13 = vld [vmem:[%s1277_s9 + $0x48] sm:$0xff]  ;;  %v1289_v17 = vld [vmem:[%s1277_s9 + $0x50] sm:$0xff]  ;;  %s1581_s11 = scalar_lea.vmem %s1622_s4, %s1271_s6 }
  0x11   : > { %v242_v12 = vld [vmem:[%s1277_s9] sm:$0xff]  ;;  %vm282_vm0 = vcmp.ne.s32.totalorder %v250_v11, 0  ;;  %vm298_vm1 = vcmp.lt.s32.totalorder %v250_v11, 16  ;;  %v426_v15 = vadd.s32 16, %v250_v11  ;;  %v243_v16 = vld [vmem:[%s1277_s9 + $0x8] sm:$0xff]  ;;  %vm283_vm5 = vcmp.ne.s32.totalorder %v1283_v13, 0 }
  0x12   : > { %vm274_vm2 = vcmp.ne.s32.totalorder %v242_v12, 0  ;;  %vm314_vm3 = vmand %vm282_vm0, %vm298_vm1  ;;  %vm290_vm4 = vcmp.lt.s32.totalorder %v242_v12, 16  ;;  %vm299_vm6 = vcmp.lt.s32.totalorder %v1283_v13, 16  ;;  %vm284_vm8 = vcmp.ne.s32.totalorder %v1289_v17, 0  ;;  %v1306_v22 = vld [vmem:[%s1277_s9 + $0x18] sm:$0xff]  ;;  %1156 = vmatpush3.bf16.msra.mxu1 %v1285_v14  ;;  %v258_v27 = vld [vmem:[%s1312_s12] sm:$0xff] }
  0x13   : > { %v442_v18 = vsel %vm314_vm3, %v426_v15, 4294967295  ;;  %v330_v19 = vsel %vm314_vm3, %v250_v11, 4294967295  ;;  %vm1294_vm7 = vmand %vm274_vm2, %vm290_vm4  ;;  %vm275_vm10 = vcmp.ne.s32.totalorder %v243_v16, 0  ;;  %vm291_vm11 = vcmp.lt.s32.totalorder %v243_v16, 16  ;;  %v1333_v28 = vld [vmem:[%s1277_s9 + $0x20] sm:$0xff]  ;;  %v259_v29 = vld [vmem:[%s1312_s12 + $0x8] sm:$0xff]  ;;  %1034 = vmatprep.mubr.msk.f32.mxu0 %vm530_vm14, %v258_v27  ;;  %1149 = vmatprep.subr.bf16.mxu1 %v1126_v54 }
  0x14   : > { %475 = vperm.xlu1 %1190, %v442_v18   ;;  %363 = vperm.xlu0 %1189, %v330_v19   ;;  %vm1300_vm9 = vmand %vm283_vm5, %vm299_vm6  ;;  %vm300_vm12 = vcmp.lt.s32.totalorder %v1289_v17, 16  ;;  %v322_v24 = vsel %vm1294_vm7, %v242_v12, 4294967295  ;;  %vm277_vm0 = vcmp.ne.s32.totalorder %v1306_v22, 0  ;;  %vm293_vm1 = vcmp.lt.s32.totalorder %v1306_v22, 16  ;;  %v260_v30 = vld [vmem:[%s1312_s12 + $0x10] sm:$0xff]  ;;  %v261_v35 = vld [vmem:[%s1312_s12 + $0x18] sm:$0xff] }
  0x15   : > { %v331_v23 = vsel %vm1300_vm9, %v1283_v13, 4294967295  ;;  %vm1319_vm13 = vmand %vm284_vm8, %vm300_vm12  ;;  %1035 = vmatmul.mubr.msk.f32.vlgmr.msra.gmra.mrb[0].mxu0 %vm530_vm14, %v259_v29  ;;  %v418_v34 = vadd.s32 16, %v242_v12  ;;  %vm278_vm3 = vcmp.ne.s32.totalorder %v1333_v28, 0  ;;  %vm294_vm4 = vcmp.lt.s32.totalorder %v1333_v28, 16  ;;  %v1353_v36 = vld [vmem:[%s1277_s9 + $0x78] sm:$0xff]  ;;  %v262_v37 = vld [vmem:[%s1312_s12 + $0x20] sm:$0xff] }
  0x16   : > { %vm1324_vm15 = vmand %vm275_vm10, %vm291_vm11  ;;  %v332_v31 = vsel %vm1319_vm13, %v1289_v17, 4294967295  ;;  %1117 = vmatpush3.bf16.msra.mxu0 %v1114_v7  ;;  %1037 = vmatprep.mubr.msk.f32.mxu0 %vm530_vm14, %v260_v30  ;;  %v419_v41 = vadd.s32 16, %v243_v16  ;;  %vm289_vm6 = vcmp.ne.s32.totalorder %v1353_v36, 0  ;;  %vm305_vm8 = vcmp.lt.s32.totalorder %v1353_v36, 16  ;;  %v253_v42 = vld [vmem:[%s1277_s9 + $0x58] sm:$0xff]  ;;  %v263_v43 = vld [vmem:[%s1312_s12 + $0x28] sm:$0xff] }
  0x17   : > { %v323_v32 = vsel %vm1324_vm15, %v243_v16, 4294967295  ;;  %vm1343_vm2 = vmand %vm277_vm0, %vm293_vm1  ;;  %1119 = vmatprep.subr.bf16.mxu0 %v1263_v8  ;;  %v434_v40 = vsel %vm1294_vm7, %v418_v34, 4294967295  ;;  %v264_v44 = vld [vmem:[%s1312_s12 + $0x30] sm:$0xff]  ;;  %vm285_vm10 = vcmp.ne.s32.totalorder %v253_v42, 0  ;;  %vm301_vm11 = vcmp.lt.s32.totalorder %v253_v42, 16  ;;  %v265_v53 = vld [vmem:[%s1312_s12 + $0x38] sm:$0xff]  ;;  %1157 = vmatpush3.bf16.msra.mxu1 %v1126_v54 }
  0x18   : > { %1191 = vset.pattern.permute.xlu1 %v1211_v3  ;;  %366 = vperm.xlu0 %1189, %v331_v23   ;;  %v325_v38 = vsel %vm1343_vm2, %v1306_v22, 4294967295  ;;  %vm1360_vm5 = vmand %vm278_vm3, %vm294_vm4  ;;  %v435_v51 = vsel %vm1324_vm15, %v419_v41, 4294967295  ;;  %v244_v52 = vld [vmem:[%s1277_s9 + $0x10] sm:$0xff]  ;;  %v266_v55 = vld [vmem:[%s1312_s12 + $0x40] sm:$0xff]  ;;  %v427_v59 = vadd.s32 16, %v1283_v13  ;;  %v428_v6 = vadd.s32 16, %v1289_v17 }
  0x19   : > { %339 = vperm.xlu1 %1191, %v322_v24   ;;  %1038 = vmatmul.mubr.msk.f32.gmra.mrb[2].mxu0 %vm530_vm14, %v261_v35  ;;  %v326_v45 = vsel %vm1360_vm5, %v1333_v28, 4294967295  ;;  %vm1385_vm7 = vmand %vm289_vm6, %vm305_vm8  ;;  %vm276_vm15 = vcmp.ne.s32.totalorder %v244_v52, 0  ;;  %vm292_vm0 = vcmp.lt.s32.totalorder %v244_v52, 16  ;;  %v267_v62 = vld [vmem:[%s1312_s12 + $0x48] sm:$0xff]  ;;  %v268_v0 = vld [vmem:[%s1312_s12 + $0x50] sm:$0xff]  ;;  %v429_v12 = vadd.s32 16, %v253_v42 }
  0x1a   : > { %1121 = vmatpush3.bf16.msra.mxu0 %v1263_v8  ;;  %1040 = vmatprep.mubr.msk.f32.mxu0 %vm530_vm14, %v262_v37  ;;  %v337_v56 = vsel %vm1385_vm7, %v1353_v36, 4294967295  ;;  %vm1406_vm12 = vmand %vm285_vm10, %vm301_vm11  ;;  %v443_v5 = vsel %vm1300_vm9, %v427_v59, 4294967295  ;;  %v237_v7 = vld [vmem:[%s1620_s2 + $0x60] sm:$0xff]  ;;  %v238_v8 = vld [vmem:[%s1620_s2 + $0x68] sm:$0xff]  ;;  %v421_v15 = vadd.s32 16, %v1306_v22  ;;  %v420_v21 = vadd.s32 16, %v244_v52 }
  0x1b   : > { %1123 = vmatprep.subr.bf16.mxu0 %v1285_v14  ;;  %v333_v63 = vsel %vm1406_vm12, %v253_v42, 4294967295  ;;  %vm1423_vm1 = vmand %vm276_vm15, %vm292_vm0  ;;  %v269_v9 = vld [vmem:[%s1312_s12 + $0x58] sm:$0xff]  ;;  %v270_v11 = vld [vmem:[%s1312_s12 + $0x60] sm:$0xff]  ;;  %v1138_v13 = vpack.c.bf16 %v238_v8, %v237_v7  ;;  %1150 = vmatprep.subr.bf16.mxu1 %v1130_v58  ;;  %v445_v20 = vsel %vm1406_vm12, %v429_v12, 4294967295  ;;  %v422_v25 = vadd.s32 16, %v1333_v28 }
  0x1c   : > { %369 = vperm.xlu0 %1189, %v332_v31   ;;  %v324_v10 = vsel %vm1423_vm1, %v244_v52, 4294967295  ;;  %v239_v16 = vld [vmem:[%s1620_s2 + $0x70] sm:$0xff]  ;;  %v240_v17 = vld [vmem:[%s1620_s2 + $0x78] sm:$0xff]  ;;  %v271_v18 = vld [vmem:[%s1312_s12 + $0x68] sm:$0xff]  ;;  %v437_v24 = vsel %vm1343_vm2, %v421_v15, 4294967295  ;;  %1158 = vmatpush3.bf16.msra.mxu1 %v1130_v58  ;;  %v436_v29 = vsel %vm1423_vm1, %v420_v21, 4294967295 }
  0x1d   : > { %342 = vperm.xlu1 %1191, %v323_v32   ;;  %1041 = vmatmul.mubr.msk.f32.gmra.mrb[4].mxu0 %vm530_vm14, %v263_v43  ;;  %v272_v19 = vld [vmem:[%s1312_s12 + $0x70] sm:$0xff]  ;;  %v254_v22 = vld [vmem:[%s1277_s9 + $0x60] sm:$0xff]  ;;  %v1142_v23 = vpack.c.bf16 %v240_v17, %v239_v16  ;;  %v273_v26 = vld [vmem:[%s1312_s12 + $0x78] sm:$0xff]  ;;  %v438_v28 = vsel %vm1360_vm5, %v422_v25, 4294967295  ;;  %v433_v31 = vadd.s32 16, %v1353_v36 }
  0x1e   : > { %1125 = vmatpush3.bf16.msra.mxu0 %v1285_v14  ;;  %1043 = vmatprep.mubr.msk.f32.mxu0 %vm530_vm14, %v264_v44  ;;  %v444_v14 = vsel %vm1319_vm13, %v428_v6, 4294967295  ;;  %vm286_vm9 = vcmp.ne.s32.totalorder %v254_v22, 0  ;;  %vm302_vm13 = vcmp.lt.s32.totalorder %v254_v22, 16  ;;  %v255_v27 = vld [vmem:[%s1277_s9 + $0x68] sm:$0xff]  ;;  %v1471_v30 = vld [vmem:[%s1277_s9 + $0x38] sm:$0xff]  ;;  %v248_v52 = vld [vmem:[%s1277_s9 + $0x30] sm:$0xff] }
  0x1f   : > { %1127 = vmatprep.subr.bf16.mxu0 %v1126_v54  ;;  %1151 = vmatprep.subr.bf16.mxu1 %v1134_v4  ;;  %vm1477_vm2 = vmand %vm286_vm9, %vm302_vm13  ;;  %vm287_vm3 = vcmp.ne.s32.totalorder %v255_v27, 0  ;;  %vm303_vm4 = vcmp.lt.s32.totalorder %v255_v27, 16  ;;  %vm281_vm6 = vcmp.ne.s32.totalorder %v1471_v30, 0  ;;  %vm297_vm8 = vcmp.lt.s32.totalorder %v1471_v30, 16  ;;  %v247_v43 = vld [vmem:[%s1277_s9 + $0x28] sm:$0xff] }
  0x20   : > { %348 = vperm.xlu0 %1189, %v325_v38   ;;  %1159 = vmatpush3.bf16.msra.mxu1 %v1134_v4  ;;  %v334_v33 = vsel %vm1477_vm2, %v254_v22, 4294967295  ;;  %v449_v34 = vsel %vm1385_vm7, %v433_v31, 4294967295  ;;  %v425_v36 = vadd.s32 16, %v1471_v30  ;;  %vm1492_vm5 = vmand %vm281_vm6, %vm297_vm8  ;;  %v431_v42 = vadd.s32 16, %v255_v27 }
  0x21   : > { %1192 = vset.pattern.permute.xlu1 %v1210_v2  ;;  %1044 = vmatmul.mubr.msk.f32.gmra.mrb[6].mxu0 %vm530_vm14, %v265_v53  ;;  %vm279_vm7 = vcmp.ne.s32.totalorder %v247_v43, 0  ;;  %vm295_vm10 = vcmp.lt.s32.totalorder %v247_v43, 16  ;;  %v423_v49 = vadd.s32 16, %v247_v43  ;;  %vm280_vm1 = vcmp.ne.s32.totalorder %v248_v52, 0 }
  0x22   : > { %451 = vperm.xlu1 %1192, %v434_v40   ;;  %1046 = vmatprep.mubr.msk.f32.mxu0 %vm530_vm14, %v266_v55  ;;  %v441_v39 = vsel %vm1492_vm5, %v425_v36, 4294967295  ;;  %v430_v40 = vadd.s32 16, %v254_v22  ;;  %vm311_vm11 = vmand %vm279_vm7, %vm295_vm10  ;;  %vm296_vm9 = vcmp.lt.s32.totalorder %v248_v52, 16  ;;  %v329_v55 = vsel %vm1492_vm5, %v1471_v30, 4294967295 }
  0x23   : > { %1129 = vmatpush3.bf16.msra.mxu0 %v1126_v54  ;;  %1152 = vmatprep.subr.bf16.mxu1 %v1138_v13  ;;  %v327_v46 = vsel %vm311_vm11, %v247_v43, 4294967295  ;;  %v439_v50 = vsel %vm311_vm11, %v423_v49, 4294967295  ;;  %vm312_vm13 = vmand %vm280_vm1, %vm296_vm9 }
  0x24   : > { %351 = vperm.xlu0 %1189, %v326_v45   ;;  %1131 = vmatprep.subr.bf16.mxu0 %v1130_v58  ;;  %v446_v41 = vsel %vm1477_vm2, %v430_v40, 4294967295  ;;  %v256_v45 = vld [vmem:[%s1277_s9 + $0x70] sm:$0xff]  ;;  %v328_v54 = vsel %vm312_vm13, %v248_v52, 4294967295 }
  0x25   : > { %1047 = vmatmul.mubr.msk.f32.gmra.mrb[8].mxu0 %vm530_vm14, %v267_v62  ;;  %1160 = vmatpush3.bf16.msra.mxu1 %v1138_v13  ;;  %vm288_vm12 = vcmp.ne.s32.totalorder %v256_v45, 0  ;;  %vm304_vm15 = vcmp.lt.s32.totalorder %v256_v45, 16 }
  0x26   : > { %454 = vperm.xlu1 %1192, %v435_v51   ;;  %1049 = vmatprep.mubr.msk.f32.mxu0 %vm530_vm14, %v268_v0  ;;  %vm1508_vm0 = vmand %vm288_vm12, %vm304_vm15  ;;  %v432_v51 = vadd.s32 16, %v256_v45 }
  0x27   : > { %1133 = vmatpush3.bf16.msra.mxu0 %v1130_v58  ;;  %1153 = vmatprep.subr.bf16.mxu1 %v1142_v23  ;;  %v336_v48 = vsel %vm1508_vm0, %v256_v45, 4294967295  ;;  %v223_v58 = vlaneseq }
  0x28   : > { %384 = vperm.xlu0 %1189, %v337_v56   ;;  %1135 = vmatprep.subr.bf16.mxu0 %v1134_v4  ;;  %v448_v53 = vsel %vm1508_vm0, %v432_v51, 4294967295  ;;  %v424_v56 = vadd.s32 16, %v248_v52 }
  0x29   : > { %1050 = vmatmul.mubr.msk.f32.gmra.mrb[10].mxu0 %vm530_vm14, %v269_v9  ;;  %1161 = vmatpush3.bf16.msra.mxu1 %v1142_v23  ;;  %v1524_v59 = vand.u32 127, %v223_v58 }
  0x2a   : > { %1193 = vset.pattern.permute.xlu1 %v1211_v3  ;;  %1052 = vmatprep.mubr.msk.f32.mxu0 %vm530_vm14, %v270_v11  ;;  %v440_v57 = vsel %vm312_vm13, %v424_v56, 4294967295 }
  0x2b   : > { %372 = vperm.xlu1 %1193, %v333_v63   ;;  %1137 = vmatpush3.bf16.msra.mxu0 %v1134_v4 }
  0x2c   : > { %1199 = vset.pattern.permute.xlu0 %v1210_v2  ;;  %1139 = vmatprep.subr.bf16.mxu0 %v1138_v13 }
  0x2d   : > { %478 = vperm.xlu0 %1199, %v443_v5   ;;  %1053 = vmatmul.mubr.msk.f32.gmra.mrb[12].mxu0 %vm530_vm14, %v271_v18 }
  0x2e   : > { %1055 = vmatprep.mubr.msk.f32.mxu0 %vm530_vm14, %v272_v19 }
  0x2f   : > { %345 = vperm.xlu1 %1193, %v324_v10   ;;  %1141 = vmatpush3.bf16.msra.mxu0 %v1138_v13 }
  0x30   : > { %1143 = vmatprep.subr.bf16.mxu0 %v1142_v23 }
  0x31   : > { %481 = vperm.xlu0 %1199, %v444_v14   ;;  %1056 = vmatmul.mubr.msk.f32.gmra.mrb[14].mxu0 %vm530_vm14, %v273_v26  ;;  %vm1487_vm14 = vmand %vm287_vm3, %vm303_vm4 }
  0x32   : > { %v335_v38 = vsel %vm1487_vm14, %v255_v27, 4294967295  ;;  %v447_v44 = vsel %vm1487_vm14, %v431_v42, 4294967295 }
  0x33   : > { %1194 = vset.pattern.permute.xlu1 %v1210_v2  ;;  %1145 = vmatpush3.bf16.msra.mxu0 %v1142_v23 }
  0x34   : > { %484 = vperm.xlu1 %1194, %v445_v20  }
  0x35   : > { %460 = vperm.xlu0 %1199, %v437_v24  }
  0x38   : > { %457 = vperm.xlu1 %1194, %v436_v29  }
  0x39   : > { %463 = vperm.xlu0 %1199, %v438_v28  }
  0x3c   : > { %1195 = vset.pattern.permute.xlu1 %v1211_v3 }
  0x3d   : > { %375 = vperm.xlu1 %1195, %v334_v33   ;;  %496 = vperm.xlu0 %1199, %v449_v34  }
  0x41   : > { %378 = vperm.xlu1 %1195, %v335_v38   ;;  %472 = vperm.xlu0 %1199, %v441_v39  }
  0x45   : > { %1196 = vset.pattern.permute.xlu1 %v1210_v2 }
  0x46   : > { %487 = vperm.xlu1 %1196, %v446_v41  }
  0x4a   : > { %490 = vperm.xlu1 %1196, %v447_v44  }
  0x4e   : > { %1197 = vset.pattern.permute.xlu1 %v1211_v3 }
  0x4f   : > { %354 = vperm.xlu1 %1197, %v327_v46  }
  0x53   : > { %381 = vperm.xlu1 %1197, %v336_v48  }
  0x57   : > { %1198 = vset.pattern.permute.xlu1 %v1210_v2 }
  0x58   : > { %466 = vperm.xlu1 %1198, %v439_v50  }
  0x5c   : > { %493 = vperm.xlu1 %1198, %v448_v53  }
  0x60   : > { %1200 = vset.pattern.permute.xlu1 %v1211_v3  ;;  %v1212_v3 = vmov 0.0  }
  0x61   : > { %357 = vperm.xlu1 %1200, %v328_v54  }
  0x65   : > { %360 = vperm.xlu1 %1200, %v329_v55  }
  0x69   : > { %1201 = vset.pattern.permute.xlu1 %v1210_v2 }
  0x6a   : > { %469 = vperm.xlu1 %1201, %v440_v57  }
  0x93   : > { %v476_v60 = vpop.permute.xlu1 %475  ;;  %v364_v61 = vpop.permute.xlu0 %363 }
  0x94   : > { %vm506_vm2 = vcmp.eq.s32.totalorder %v1524_v59, %v476_v60  ;;  %vm394_vm3 = vcmp.eq.s32.totalorder %v1524_v59, %v364_v61 }
  0x95   : > { %v410_v62 = vsel %vm394_vm3, 1.0, %v1212_v3 }
  0x96   : > { %v522_v63 = vsel %vm506_vm2, 1.0, %v410_v62 }
  0x97   : > { %1102 = vmatprep.mubr.f32.mxu1 %v522_v63  ;;  %v367_v0 = vpop.permute.xlu0 %366 }
  0x98   : > { %v340_v1 = vpop.permute.xlu1 %339  ;;  %vm395_vm5 = vcmp.eq.s32.totalorder %v1524_v59, %v367_v0 }
  0x99   : > { %vm386_vm4 = vcmp.eq.s32.totalorder %v1524_v59, %v340_v1  ;;  %v411_v15 = vsel %vm395_vm5, 1.0, %v1212_v3 }
  0x9a   : > { %v402_v7 = vsel %vm386_vm4, 1.0, %v1212_v3 }
  0x9b   : > { %v370_v4 = vpop.permute.xlu0 %369 }
  0x9c   : > { %v343_v5 = vpop.permute.xlu1 %342  ;;  %vm396_vm7 = vcmp.eq.s32.totalorder %v1524_v59, %v370_v4 }
  0x9d   : > { %vm387_vm8 = vcmp.eq.s32.totalorder %v1524_v59, %v343_v5  ;;  %v412_v19 = vsel %vm396_vm7, 1.0, %v1212_v3 }
  0x9e   : > { %v403_v11 = vsel %vm387_vm8, 1.0, %v1212_v3 }
  0x9f   : > { %v349_v2 = vpop.permute.xlu0 %348 }
  0xa0   : > { %vm389_vm15 = vcmp.eq.s32.totalorder %v1524_v59, %v349_v2 }
  0xa1   : > { %v452_v6 = vpop.permute.xlu1 %451  ;;  %v405_v25 = vsel %vm389_vm15, 1.0, %v1212_v3 }
  0xa2   : > { %vm498_vm6 = vcmp.eq.s32.totalorder %v1524_v59, %v452_v6 }
  0xa3   : > { %v514_v8 = vsel %vm498_vm6, 1.0, %v402_v7  ;;  %v352_v9 = vpop.permute.xlu0 %351 }
  0xa4   : > { %1090 = vmatprep.mubr.f32.mxu0 %v514_v8  ;;  %vm390_vm0 = vcmp.eq.s32.totalorder %v1524_v59, %v352_v9 }
  0xa5   : > { %v455_v10 = vpop.permute.xlu1 %454  ;;  %v406_v27 = vsel %vm390_vm0, 1.0, %v1212_v3 }
  0xa6   : > { %vm499_vm14 = vcmp.eq.s32.totalorder %v1524_v59, %v455_v10 }
  0xa7   : > { %v515_v12 = vsel %vm499_vm14, 1.0, %v403_v11  ;;  %v1535_v13 = vpop.permute.xlu0 %384 }
  0xa8   : > { %1091 = vmatmul.mubr.f32.vlgmr.msra.gmra.mrb[0].mxu0 %v515_v12  ;;  %vm401_vm7 = vcmp.eq.s32.totalorder %v1524_v59, %v1535_v13 }
  0xa9   : > { %v417_v48 = vsel %vm401_vm7, 1.0, %v1212_v3 }
  0xaa   : > { %v373_v14 = vpop.permute.xlu1 %372 }
  0xab   : > { %vm397_vm11 = vcmp.eq.s32.totalorder %v1524_v59, %v373_v14 }
  0xac   : > { %v479_v16 = vpop.permute.xlu0 %478  ;;  %v413_v23 = vsel %vm397_vm11, 1.0, %v1212_v3 }
  0xad   : > { %vm507_vm10 = vcmp.eq.s32.totalorder %v1524_v59, %v479_v16 }
  0xae   : > { %v523_v17 = vsel %vm507_vm10, 1.0, %v411_v15  ;;  %v346_v18 = vpop.permute.xlu1 %345 }
  0xaf   : > { %1103 = vmatmul.mubr.f32.vlgmr.msra.gmra.mrb[0].mxu1 %v523_v17  ;;  %vm388_vm9 = vcmp.eq.s32.totalorder %v1524_v59, %v346_v18 }
  0xb0   : > { %v482_v20 = vpop.permute.xlu0 %481  ;;  %v404_v30 = vsel %vm388_vm9, 1.0, %v1212_v3 }
  0xb1   : > { %vm508_vm12 = vcmp.eq.s32.totalorder %v1524_v59, %v482_v20 }
  0xb2   : > { %v524_v21 = vsel %vm508_vm12, 1.0, %v412_v19 }
  0xb3   : > { %v485_v22 = vpop.permute.xlu1 %484  ;;  %1105 = vmatprep.mubr.f32.mxu1 %v524_v21 }
  0xb4   : > { %vm509_vm1 = vcmp.eq.s32.totalorder %v1524_v59, %v485_v22  ;;  %v461_v24 = vpop.permute.xlu0 %460 }
  0xb5   : > { %v525_v26 = vsel %vm509_vm1, 1.0, %v413_v23  ;;  %vm501_vm13 = vcmp.eq.s32.totalorder %v1524_v59, %v461_v24 }
  0xb6   : > { %1106 = vmatmul.mubr.f32.gmra.mrb[2].mxu1 %v525_v26  ;;  %v517_v28 = vsel %vm501_vm13, 1.0, %v405_v25 }
  0xb7   : > { %v458_v29 = vpop.permute.xlu1 %457 }
  0xb8   : > { %vm500_vm2 = vcmp.eq.s32.totalorder %v1524_v59, %v458_v29  ;;  %v464_v31 = vpop.permute.xlu0 %463 }
  0xb9   : > { %v516_v32 = vsel %vm500_vm2, 1.0, %v404_v30  ;;  %vm502_vm3 = vcmp.eq.s32.totalorder %v1524_v59, %v464_v31  ;;  %vm869_vm2 = vcmask 523264  }
  0xba   : > { %v518_v33 = vsel %vm502_vm3, 1.0, %v406_v27  ;;  %1093 = vmatprep.mubr.f32.mxu0 %v516_v32 }
  0xbb   : > { %1094 = vmatmul.mubr.f32.gmra.mrb[2].mxu0 %v517_v28 }
  0xbc   : > { %v376_v34 = vpop.permute.xlu1 %375  ;;  %1096 = vmatprep.mubr.f32.mxu0 %v518_v33  ;;  %v497_v45 = vpop.permute.xlu0 %496 }
  0xbd   : > { %vm398_vm4 = vcmp.eq.s32.totalorder %v1524_v59, %v376_v34  ;;  %vm513_vm12 = vcmp.eq.s32.totalorder %v1524_v59, %v497_v45 }
  0xbe   : > { %v414_v37 = vsel %vm398_vm4, 1.0, %v1212_v3  ;;  %v529_v52 = vsel %vm513_vm12, 1.0, %v417_v48 }
  0xc0   : > { %v379_v35 = vpop.permute.xlu1 %378  ;;  %v473_v55 = vpop.permute.xlu0 %472 }
  0xc1   : > { %vm399_vm8 = vcmp.eq.s32.totalorder %v1524_v59, %v379_v35  ;;  %vm505_vm13 = vcmp.eq.s32.totalorder %v1524_v59, %v473_v55 }
  0xc2   : > { %v415_v40 = vsel %vm399_vm8, 1.0, %v1212_v3 }
  0xc5   : > { %v488_v36 = vpop.permute.xlu1 %487 }
  0xc6   : > { %vm510_vm6 = vcmp.eq.s32.totalorder %v1524_v59, %v488_v36 }
  0xc7   : > { %v526_v38 = vsel %vm510_vm6, 1.0, %v414_v37 }
  0xc8   : > { %1108 = vmatprep.mubr.f32.mxu1 %v526_v38 }
  0xc9   : > { %v491_v39 = vpop.permute.xlu1 %490 }
  0xca   : > { %vm511_vm14 = vcmp.eq.s32.totalorder %v1524_v59, %v491_v39 }
  0xcb   : > { %v527_v41 = vsel %vm511_vm14, 1.0, %v415_v40 }
  0xcc   : > { %1109 = vmatmul.mubr.f32.gmra.mrb[4].mxu1 %v527_v41 }
  0xce   : > { %v355_v42 = vpop.permute.xlu1 %354 }
  0xcf   : > { %vm391_vm5 = vcmp.eq.s32.totalorder %v1524_v59, %v355_v42 }
  0xd0   : > { %v407_v46 = vsel %vm391_vm5, 1.0, %v1212_v3 }
  0xd2   : > { %v382_v43 = vpop.permute.xlu1 %381 }
  0xd3   : > { %vm400_vm11 = vcmp.eq.s32.totalorder %v1524_v59, %v382_v43 }
  0xd4   : > { %v416_v50 = vsel %vm400_vm11, 1.0, %v1212_v3 }
  0xd7   : > { %v467_v44 = vpop.permute.xlu1 %466 }
  0xd8   : > { %vm503_vm10 = vcmp.eq.s32.totalorder %v1524_v59, %v467_v44 }
  0xd9   : > { %v519_v47 = vsel %vm503_vm10, 1.0, %v407_v46 }
  0xda   : > { %1097 = vmatmul.mubr.f32.gmra.mrb[4].mxu0 %v519_v47 }
  0xdb   : > { %v494_v49 = vpop.permute.xlu1 %493 }
  0xdc   : > { %vm512_vm15 = vcmp.eq.s32.totalorder %v1524_v59, %v494_v49 }
  0xdd   : > { %v528_v51 = vsel %vm512_vm15, 1.0, %v416_v50 }
  0xde   : > { %1111 = vmatprep.mubr.f32.mxu1 %v528_v51 }
  0xdf   : > { %1112 = vmatmul.mubr.f32.gmra.mrb[6].mxu1 %v529_v52 }
  0xe0   : > { %v358_v53 = vpop.permute.xlu1 %357 }
  0xe1   : > { %vm392_vm1 = vcmp.eq.s32.totalorder %v1524_v59, %v358_v53 }
  0xe2   : > { %v408_v58 = vsel %vm392_vm1, 1.0, %v1212_v3 }
  0xe4   : > { %v361_v54 = vpop.permute.xlu1 %360 }
  0xe5   : > { %vm393_vm0 = vcmp.eq.s32.totalorder %v1524_v59, %v361_v54 }
  0xe6   : > { %v409_v56 = vsel %vm393_vm0, 1.0, %v1212_v3 }
  0xe7   : > { %v521_v61 = vsel %vm505_vm13, 1.0, %v409_v56 }
  0xe9   : > { %v470_v57 = vpop.permute.xlu1 %469 }
  0xea   : > { %vm504_vm9 = vcmp.eq.s32.totalorder %v1524_v59, %v470_v57 }
  0xeb   : > { %v520_v60 = vsel %vm504_vm9, 1.0, %v408_v58 }
  0xec   : > { %1099 = vmatprep.mubr.f32.mxu0 %v520_v60 }
  0xed   : > { %1100 = vmatmul.mubr.f32.gmra.mrb[6].mxu0 %v521_v61 }
  0xf8   : > { %v1048_v62 = vpop.f32.mrb[8].mxu0 }
  0xf9   : > { %v685_v63 = vpop.f32.mrb[9].mxu0 }
  0xfc   : > { %v1051_v0 = vpop.f32.mrb[10].mxu0 }
  0xfd   : > { %v695_v1 = vpop.f32.mrb[11].mxu0 }
 0x100   : > { %v1054_v4 = vpop.f32.mrb[12].mxu0 }
 0x101   : > { %v705_v5 = vpop.f32.mrb[13].mxu0 }
 0x104   : > { %v1057_v2 = vpop.f32.mrb[14].mxu0 }
 0x105   : > { %v715_v6 = vpop.f32.mrb[15].mxu0 }
 0x17b   : > { %v1092_v59 = vpop.f32.mrb[0].mxu0 }
 0x17c   : > { %871 = vst.msk [vmem:[%s1581_s11 + $0x8] sm:$0xff] %vm869_vm2, %v1092_v59  ;;  %v790_v3 = vpop.f32.mrb[1].mxu0 }
 0x17d   : > { %870 = vst.msk [vmem:[%s1581_s11] sm:$0xff] %vm869_vm2, %v790_v3 }
 0x182   : > { %v1104_v7 = vpop.f32.mrb[0].mxu1 }
 0x183   : > { %v836_v8 = vadd.f32 %v1104_v7, %v1048_v62  ;;  %v830_v9 = vpop.f32.mrb[1].mxu1 }
 0x184   : > { %v831_v10 = vadd.f32 %v830_v9, %v685_v63 }
 0x185   : > { %879 = vst.msk [vmem:[%s1581_s11 + $0x48] sm:$0xff] %vm869_vm2, %v836_v8 }
 0x186   : > { %878 = vst.msk [vmem:[%s1581_s11 + $0x40] sm:$0xff] %vm869_vm2, %v831_v10 }
 0x189   : > { %v1107_v11 = vpop.f32.mrb[2].mxu1 }
 0x18a   : > { %v846_v12 = vadd.f32 %v1107_v11, %v1051_v0  ;;  %v840_v13 = vpop.f32.mrb[3].mxu1 }
 0x18b   : > { %v841_v14 = vadd.f32 %v840_v13, %v695_v1 }
 0x18c   : > { %881 = vst.msk [vmem:[%s1581_s11 + $0x58] sm:$0xff] %vm869_vm2, %v846_v12 }
 0x18d   : > { %880 = vst.msk [vmem:[%s1581_s11 + $0x50] sm:$0xff] %vm869_vm2, %v841_v14 }
 0x18e   : > { %v1095_v15 = vpop.f32.mrb[2].mxu0 }
 0x18f   : > { %873 = vst.msk [vmem:[%s1581_s11 + $0x18] sm:$0xff] %vm869_vm2, %v1095_v15  ;;  %v800_v16 = vpop.f32.mrb[3].mxu0 }
 0x190   : > { %872 = vst.msk [vmem:[%s1581_s11 + $0x10] sm:$0xff] %vm869_vm2, %v800_v16 }
 0x19f   : > { %v1110_v17 = vpop.f32.mrb[4].mxu1 }
 0x1a0   : > { %v856_v18 = vadd.f32 %v1110_v17, %v1054_v4  ;;  %v850_v19 = vpop.f32.mrb[5].mxu1 }
 0x1a1   : > { %v851_v20 = vadd.f32 %v850_v19, %v705_v5 }
 0x1a2   : > { %883 = vst.msk [vmem:[%s1581_s11 + $0x68] sm:$0xff] %vm869_vm2, %v856_v18 }
 0x1a3   : > { %882 = vst.msk [vmem:[%s1581_s11 + $0x60] sm:$0xff] %vm869_vm2, %v851_v20 }
 0x1ad   : > { %v1098_v21 = vpop.f32.mrb[4].mxu0 }
 0x1ae   : > { %875 = vst.msk [vmem:[%s1581_s11 + $0x28] sm:$0xff] %vm869_vm2, %v1098_v21  ;;  %v810_v22 = vpop.f32.mrb[5].mxu0 }
 0x1af   : > { %874 = vst.msk [vmem:[%s1581_s11 + $0x20] sm:$0xff] %vm869_vm2, %v810_v22 }
 0x1b2   : > { %v1113_v23 = vpop.f32.mrb[6].mxu1 }
 0x1b3   : > { %v866_v24 = vadd.f32 %v1113_v23, %v1057_v2  ;;  %v860_v25 = vpop.f32.mrb[7].mxu1 }
 0x1b4   : > { %v861_v26 = vadd.f32 %v860_v25, %v715_v6 }
 0x1b5   : > { %885 = vst.msk [vmem:[%s1581_s11 + $0x78] sm:$0xff] %vm869_vm2, %v866_v24 }
 0x1b6   : > { %884 = vst.msk [vmem:[%s1581_s11 + $0x70] sm:$0xff] %vm869_vm2, %v861_v26 }
 0x1c0   : > { %v1101_v27 = vpop.f32.mrb[6].mxu0 }
 0x1c1   : > { %877 = vst.msk [vmem:[%s1581_s11 + $0x38] sm:$0xff] %vm869_vm2, %v1101_v27  ;;  %v820_v29 = vpop.f32.mrb[7].mxu0 }
 0x1c2   : > { %876 = vst.msk [vmem:[%s1581_s11 + $0x30] sm:$0xff] %vm869_vm2, %v820_v29 }
 0x1c3 PF: > { %s14_s15 = sadd.s32 1, %s1208_s15  }
 0x1c4   : > { %p11_p4 = scmp.ge.s32.totalorder %s14_s15, 4  }
 0x1c6   :  { %13 = sbr.rel (!%p11_p4) target bundleno = 1 (0x1), region = 69 }

</bundles_post_ra>
